<compile_context>
chip_gen: v6e
topology: v6e:2x2x1
jax: 0.10.0
libtpu: 0.0.40
codegen_flags: <defaults>
</compile_context>

<pallas_src>
import math
import functools

import jax
import jax.numpy as jnp
from jax import lax
from jax.experimental import pallas as pl
from jax.experimental.pallas import tpu as pltpu


# ----------------------------- helpers --------------------------------------

def _tile(n, target):
    """Largest tile <= target that divides n (falls back to a single block)."""
    if n <= target:
        return n
    t = target
    while t >= 8:
        if n % t == 0:
            return t
        t //= 2
    return n


def _lorentz_project(y, is_time, c, scale_val, time_sign):
    """Project a linear output onto the Lorentz manifold (LorentzLinear tail).

    time_sign=-1 folds the Minkowski sign flip (used by cinner) into q's time
    coordinate so the attention matmul is a plain dot product.
    """
    time = jax.nn.sigmoid(y[:, 0:1]) * scale_val + (math.sqrt(c) + 0.5)
    narrow = jnp.where(is_time, 0.0, y)                      # spatial part, col 0 zeroed
    sq = jnp.maximum(jnp.sum(narrow * narrow, axis=-1, keepdims=True), 1e-8)
    sf = jnp.sqrt(jnp.maximum((time * time - c) / sq, 1e-8))
    return jnp.where(is_time, time_sign * time, narrow * sf)


# ----------------------------- kernels ---------------------------------------

def _proj_kernel(x_ref, wlin_ref, blin_ref, wqk_ref, bqk_ref, qs_ref, hk_ref, *,
                 c, scale_val):
    """Fused LorentzLinear (x->h) and fused query/key LorentzLinears (h->q,k)."""
    d = blin_ref.shape[-1]
    # dropout is eval-mode identity; nonlin=None
    y = jnp.dot(x_ref[...], wlin_ref[...],
                preferred_element_type=jnp.float32) + blin_ref[...]
    is_time = lax.broadcasted_iota(jnp.int32, y.shape, 1) == 0   # built once, reused 3x
    h = _lorentz_project(y, is_time, c, scale_val, 1.0)

    # One (D, 2D) matmul for both q and k projections.
    yqk = jnp.dot(h, wqk_ref[...],
                  preferred_element_type=jnp.float32) + bqk_ref[...]
    q_s = _lorentz_project(yqk[:, :d], is_time, c, scale_val, -1.0)  # sign folded into q
    k = _lorentz_project(yqk[:, d:], is_time, c, scale_val, 1.0)

    qs_ref[...] = q_s
    hk_ref[...] = jnp.concatenate([h, k], axis=-1)   # single denser (2D-wide) store


def _agg_skip_kernel(x_ref, qs_ref, hk_ref, adj_ref, o_ref, acc_ref, *,
                     c, att_a, att_b, x_i, apply_skip):
    """Tiled LorentzAgg (use_att=True, local_agg=True) + fused SkipLayer residual."""
    d = qs_ref.shape[-1]
    j = pl.program_id(1)

    @pl.when(j == 0)
    def _():
        acc_ref[...] = jnp.zeros_like(acc_ref)

    hk = hk_ref[...]
    h = hk[:, :d]
    k = hk[:, d:]
    # manifold.cinner(query, key): Minkowski sign already folded into q_s;
    # contract last dims directly (no k.T materialized).
    cin = lax.dot_general(qs_ref[...], k, (((1,), (1,)), ((), ())),
                          preferred_element_type=jnp.float32)
    # (2 + 2*cin)/scale + bias  ==  cin*att_a + att_b  (constants folded)
    att = jax.nn.sigmoid(cin * att_a + att_b)
    att = adj_ref[...].astype(jnp.float32) * att
    acc_ref[...] += jnp.dot(att, h, preferred_element_type=jnp.float32)

    @pl.when(j == pl.num_programs(1) - 1)
    def _():
        support = acc_ref[...]
        sign = jnp.where(
            lax.broadcasted_iota(jnp.int32, support.shape, 1) == 0, -1.0, 1.0)
        inner = jnp.sum(sign * support * support, axis=-1, keepdims=True)
        # agg: support / (sqrt(clamp(|inner|)) / sqrt(c))  ==  support*sqrt(c)*rsqrt(...)
        h_agg = support * (lax.rsqrt(jnp.maximum(jnp.abs(inner), 1e-8)) * math.sqrt(c))
        if apply_skip:   # in_dim == out_dim (static)
            ave = x_ref[...] * x_i + h_agg
            inner2 = jnp.sum(sign * ave * ave, axis=-1, keepdims=True)
            out = ave * (lax.rsqrt(jnp.maximum(jnp.abs(inner2), 1e-8))
                         * (1.0 / math.sqrt(c)))
        else:
            out = h_agg
        o_ref[...] = out


# ----------------------------- wrappers ---------------------------------------

_VMEM_LIMIT = 32 * 1024 * 1024   # safe on v5e/v6e/v7x (v7x: 64 MiB physical per TC)


def lorentz_proj_hqk(x, params, *, c, scale_val):
    n, din = x.shape
    d = params["lin_w"].shape[1]
    w_lin = params["lin_w"]
    b_lin = params["lin_b"].reshape(1, d)
    w_qk = jnp.concatenate([params["q_w"], params["k_w"]], axis=1)      # (d, 2d)
    b_qk = jnp.concatenate([params["q_b"], params["k_b"]]).reshape(1, 2 * d)
    tr = _tile(n, 256)
    kern = functools.partial(_proj_kernel, c=c, scale_val=scale_val)
    return pl.pallas_call(
        kern,
        out_shape=(jax.ShapeDtypeStruct((n, d), jnp.float32),
                   jax.ShapeDtypeStruct((n, 2 * d), jnp.float32)),
        grid=(n // tr,),
        in_specs=[
            pl.BlockSpec((tr, din), lambda i: (i, 0)),
            pl.BlockSpec((din, d), lambda i: (0, 0)),
            pl.BlockSpec((1, d), lambda i: (0, 0)),
            pl.BlockSpec((d, 2 * d), lambda i: (0, 0)),
            pl.BlockSpec((1, 2 * d), lambda i: (0, 0)),
        ],
        out_specs=(pl.BlockSpec((tr, d), lambda i: (i, 0)),
                   pl.BlockSpec((tr, 2 * d), lambda i: (i, 0))),
        compiler_params=pltpu.CompilerParams(
            dimension_semantics=("parallel",),
            vmem_limit_bytes=_VMEM_LIMIT),
    )(x, w_lin, b_lin, w_qk, b_qk)


def lorentz_agg_skip(x, qs, hk, adj, *, c, att_scale, att_bias, x_i, apply_skip):
    n, d = qs.shape
    tq = _tile(n, 256)   # row tile ('parallel' axis -> sharded across v7x's 2 TCs)
    tk = _tile(n, 512)   # kv/reduction tile ('arbitrary', last grid axis)
    att_a = 2.0 / att_scale
    att_b = 2.0 / att_scale + att_bias
    kern = functools.partial(_agg_skip_kernel, c=c, att_a=att_a, att_b=att_b,
                             x_i=x_i, apply_skip=apply_skip)
    return pl.pallas_call(
        kern,
        out_shape=jax.ShapeDtypeStruct((n, d), jnp.float32),
        grid=(n // tq, n // tk),
        in_specs=[
            pl.BlockSpec((tq, d), lambda i, j: (i, 0)),        # x (skip branch)
            pl.BlockSpec((tq, d), lambda i, j: (i, 0)),        # q (sign-folded)
            pl.BlockSpec((tk, 2 * d), lambda i, j: (j, 0)),    # [h | k]
            pl.BlockSpec((tq, tk), lambda i, j: (i, j)),       # adj (native dtype)
        ],
        out_specs=pl.BlockSpec((tq, d), lambda i, j: (i, 0)),
        scratch_shapes=[pltpu.VMEM((tq, d), jnp.float32)],     # support accumulator
        compiler_params=pltpu.CompilerParams(
            dimension_semantics=("parallel", "arbitrary"),
            vmem_limit_bytes=_VMEM_LIMIT),
    )(x, qs, hk, adj)


def skip_layer_forward(x, adj, params, *, c, scale_val, att_scale, att_bias, x_i,
                       in_dim, out_dim):
    qs, hk = lorentz_proj_hqk(x, params, c=c, scale_val=scale_val)
    apply_skip = (in_dim == out_dim)
    # When in_dim != out_dim the skip branch is inactive; pass a dummy x block.
    x_skip = x if apply_skip else jnp.zeros((x.shape[0], out_dim), jnp.float32)
    out = lorentz_agg_skip(x_skip, qs, hk, adj, c=c, att_scale=att_scale,
                           att_bias=att_bias, x_i=x_i, apply_skip=apply_skip)
    return out, adj


# ----------------------------- pure-JAX reference -----------------------------

def _ref_lorentz_linear(x, w_t, b, c, scale_val):
    y = x @ w_t + b
    time = jax.nn.sigmoid(y[:, :1]) * scale_val + (math.sqrt(c) + 0.5)
    narrow = y[:, 1:]
    sq = jnp.maximum(jnp.sum(narrow * narrow, -1, keepdims=True), 1e-8)
    sf = jnp.sqrt(jnp.maximum((time * time - c) / sq, 1e-8))
    return jnp.concatenate([time, narrow * sf], axis=-1)


def _ref_forward(x, adj, params, c, scale_val, att_scale, att_bias, x_i):
    h = _ref_lorentz_linear(x, params["lin_w"], params["lin_b"], c, scale_val)
    q = _ref_lorentz_linear(h, params["q_w"], params["q_b"], c, scale_val)
    k = _ref_lorentz_linear(h, params["k_w"], params["k_b"], c, scale_val)
    qm = jnp.concatenate([-q[:, :1], q[:, 1:]], axis=-1)
    att = jax.nn.sigmoid((2.0 + 2.0 * (qm @ k.T)) / att_scale + att_bias) * adj
    support = att @ h
    inner = -support[:, :1] ** 2 + jnp.sum(support[:, 1:] ** 2, -1, keepdims=True)
    denom = jnp.sqrt(jnp.maximum(jnp.abs(inner), 1e-8)) / math.sqrt(c)
    h_agg = support / denom
    ave = x * x_i + h_agg
    inner2 = -ave[:, :1] ** 2 + jnp.sum(ave[:, 1:] ** 2, -1, keepdims=True)
    denom2 = jnp.sqrt(jnp.maximum(jnp.abs(inner2), 1e-8)) * math.sqrt(c)
    return ave / denom2


# ----------------------------- main -------------------------------------------

if __name__ == "__main__":
    N, in_dim, out_dim = 16, 32, 32
    c = 1.0
    x_i = 0.5                                         # nn.Parameter(torch.tensor(0.5))
    scale_val = min(math.exp(math.log(10.0)), 10.0)   # scale.exp().clamp_max(10)
    att_scale = math.sqrt(out_dim)                    # LorentzAgg.scale init
    att_bias = 20.0                                   # LorentzAgg.bias init

    key = jax.random.PRNGKey(0)
    k1, k2, k3, k4, k5 = jax.random.split(key, 5)
    x = jax.random.normal(k1, (N, in_dim), jnp.float32)
    adj = (jax.random.uniform(k2, (N, N)) > 0.5).astype(jnp.float32)
    adj = jnp.maximum(adj, jnp.eye(N, dtype=jnp.float32))   # self loops

    def init_lorentz_linear(k, din, dout):
        stdv = 1.0 / math.sqrt(dout)
        w = jax.random.uniform(k, (dout, din), jnp.float32, -stdv, stdv)  # torch (out, in)
        w = w.at[:, 0].set(0.0)                # reset_parameters zeroes input column 0
        return w.T, jnp.zeros((dout,), jnp.float32)

    lin_w, lin_b = init_lorentz_linear(k3, in_dim, out_dim)
    q_w, q_b = init_lorentz_linear(k4, out_dim, out_dim)
    k_w, k_b = init_lorentz_linear(k5, out_dim, out_dim)
    params = {"lin_w": lin_w, "lin_b": lin_b, "q_w": q_w, "q_b": q_b,
              "k_w": k_w, "k_b": k_b}

    out, adj_out = skip_layer_forward(
        x, adj, params, c=c, scale_val=scale_val, att_scale=att_scale,
        att_bias=att_bias, x_i=x_i, in_dim=in_dim, out_dim=out_dim)
    out = jax.block_until_ready(out)

    ref = _ref_forward(x, adj, params, c, scale_val, att_scale, att_bias, x_i)
    assert out.shape == (N, out_dim)
    assert bool(jnp.all(jnp.isfinite(out)))
    assert bool(jnp.allclose(out, ref, rtol=2e-2, atol=2e-2))
    # TODO(synk): training-mode dropout RNG not implemented (eval-mode identity).
    print("KERNEL_OK")
</pallas_src>

<mosaic_0001>
module attributes {stable_mosaic.version = 11 : i64} {
  func.func @_proj_kernel(%arg0: i32, %arg1: memref<16x32xf32, #tpu.memory_space<vmem>>, %arg2: memref<32x32xf32, #tpu.memory_space<vmem>>, %arg3: memref<1x32xf32, #tpu.memory_space<vmem>>, %arg4: memref<32x64xf32, #tpu.memory_space<vmem>>, %arg5: memref<1x64xf32, #tpu.memory_space<vmem>>, %arg6: memref<16x32xf32, #tpu.memory_space<vmem>>, %arg7: memref<16x64xf32, #tpu.memory_space<vmem>>) attributes {dimension_semantics = [#tpu.dimension_semantics<parallel>], iteration_bounds = array<i64: 1>, scalar_prefetch = 0 : i64, scratch_operands = 0 : i64, tpu.core_type = #tpu.core_type<tc>, window_params = [{transform_indices = @transform_0, window_bounds = array<i64: 16, 32>}, {pipeline_mode = #tpu.pipeline_mode<synchronous>, transform_indices = @transform_1, window_bounds = array<i64: 32, 32>}, {pipeline_mode = #tpu.pipeline_mode<synchronous>, transform_indices = @transform_2, window_bounds = array<i64: 1, 32>}, {pipeline_mode = #tpu.pipeline_mode<synchronous>, transform_indices = @transform_3, window_bounds = array<i64: 32, 64>}, {pipeline_mode = #tpu.pipeline_mode<synchronous>, transform_indices = @transform_4, window_bounds = array<i64: 1, 64>}, {transform_indices = @transform_5, window_bounds = array<i64: 16, 32>}, {transform_indices = @transform_6, window_bounds = array<i64: 16, 64>}]} {
    %c0 = arith.constant 0 : index
    %c0_0 = arith.constant 0 : index
    %0 = vector.load %arg1[%c0, %c0_0] : memref<16x32xf32, #tpu.memory_space<vmem>>, vector<16x32xf32>
    %c0_1 = arith.constant 0 : index
    %c0_2 = arith.constant 0 : index
    %1 = vector.load %arg2[%c0_1, %c0_2] : memref<32x32xf32, #tpu.memory_space<vmem>>, vector<32x32xf32>
    %cst = arith.constant dense<0.000000e+00> : vector<16x32xf32>
    %2 = tpu.matmul %0, %1, %cst {dimension_numbers = #tpu.dot_dimension_numbers<[1], [0], [0], [1], [0, 0, 1, 1], [], []>} : vector<16x32xf32>, vector<32x32xf32>, vector<16x32xf32> -> vector<16x32xf32>
    %c0_3 = arith.constant 0 : index
    %c0_4 = arith.constant 0 : index
    %3 = vector.load %arg3[%c0_3, %c0_4] : memref<1x32xf32, #tpu.memory_space<vmem>>, vector<1x32xf32>
    %4 = vector.broadcast %3 : vector<1x32xf32> to vector<16x32xf32>
    %5 = arith.addf %2, %4 : vector<16x32xf32>
    %6 = tpu.iota {dimensions = array<i32: 1>} : vector<16x32xi32>
    %c0_i32 = arith.constant 0 : i32
    %7 = vector.broadcast %c0_i32 : i32 to vector<16x32xi32>
    %8 = arith.cmpi eq, %6, %7 : vector<16x32xi32>
    %9 = vector.extract_strided_slice %5 {offsets = [0, 0], sizes = [16, 1], strides = [1, 1]} : vector<16x32xf32> to vector<16x1xf32>
    %10 = arith.negf %9 : vector<16x1xf32>
    %11 = math.exp %10 : vector<16x1xf32>
    %cst_5 = arith.constant 1.000000e+00 : f32
    %12 = vector.broadcast %cst_5 : f32 to vector<16x1xf32>
    %13 = arith.addf %12, %11 : vector<16x1xf32>
    %14 = arith.divf %12, %13 : vector<16x1xf32>
    %cst_6 = arith.constant 1.000000e+01 : f32
    %15 = vector.broadcast %cst_6 : f32 to vector<16x1xf32>
    %16 = arith.mulf %14, %15 : vector<16x1xf32>
    %cst_7 = arith.constant 1.500000e+00 : f32
    %17 = vector.broadcast %cst_7 : f32 to vector<16x1xf32>
    %18 = arith.addf %16, %17 : vector<16x1xf32>
    %cst_8 = arith.constant 0.000000e+00 : f32
    %19 = vector.broadcast %cst_8 : f32 to vector<16x32xf32>
    %20 = arith.select %8, %19, %5 : vector<16x32xi1>, vector<16x32xf32>
    %21 = arith.mulf %20, %20 : vector<16x32xf32>
    %cst_9 = arith.constant dense<0.000000e+00> : vector<16xf32>
    %22 = vector.multi_reduction <add>, %21, %cst_9 [1] : vector<16x32xf32> to vector<16xf32>
    %23 = vector.shape_cast %22 : vector<16xf32> to vector<16x1xf32>
    %cst_10 = arith.constant 9.99999993E-9 : f32
    %24 = vector.broadcast %cst_10 : f32 to vector<16x1xf32>
    %25 = arith.maximumf %23, %24 : vector<16x1xf32>
    %26 = arith.mulf %18, %18 : vector<16x1xf32>
    %cst_11 = arith.constant 1.000000e+00 : f32
    %27 = vector.broadcast %cst_11 : f32 to vector<16x1xf32>
    %28 = arith.subf %26, %27 : vector<16x1xf32>
    %29 = arith.divf %28, %25 : vector<16x1xf32>
    %cst_12 = arith.constant 9.99999993E-9 : f32
    %30 = vector.broadcast %cst_12 : f32 to vector<16x1xf32>
    %31 = arith.maximumf %29, %30 : vector<16x1xf32>
    %32 = math.sqrt %31 : vector<16x1xf32>
    %cst_13 = arith.constant 1.000000e+00 : f32
    %33 = vector.broadcast %cst_13 : f32 to vector<16x1xf32>
    %34 = arith.mulf %33, %18 : vector<16x1xf32>
    %35 = vector.broadcast %32 : vector<16x1xf32> to vector<16x32xf32>
    %36 = arith.mulf %20, %35 : vector<16x32xf32>
    %37 = vector.shape_cast %34 : vector<16x1xf32> to vector<16x1xf32>
    %38 = vector.broadcast %37 : vector<16x1xf32> to vector<16x32xf32>
    %39 = arith.select %8, %38, %36 : vector<16x32xi1>, vector<16x32xf32>
    %c0_14 = arith.constant 0 : index
    %c0_15 = arith.constant 0 : index
    %40 = vector.load %arg4[%c0_14, %c0_15] : memref<32x64xf32, #tpu.memory_space<vmem>>, vector<32x64xf32>
    %cst_16 = arith.constant dense<0.000000e+00> : vector<16x64xf32>
    %41 = tpu.matmul %39, %40, %cst_16 {dimension_numbers = #tpu.dot_dimension_numbers<[1], [0], [0], [1], [0, 0, 1, 1], [], []>} : vector<16x32xf32>, vector<32x64xf32>, vector<16x64xf32> -> vector<16x64xf32>
    %c0_17 = arith.constant 0 : index
    %c0_18 = arith.constant 0 : index
    %42 = vector.load %arg5[%c0_17, %c0_18] : memref<1x64xf32, #tpu.memory_space<vmem>>, vector<1x64xf32>
    %43 = vector.broadcast %42 : vector<1x64xf32> to vector<16x64xf32>
    %44 = arith.addf %41, %43 : vector<16x64xf32>
    %45 = vector.extract_strided_slice %44 {offsets = [0, 0], sizes = [16, 32], strides = [1, 1]} : vector<16x64xf32> to vector<16x32xf32>
    %46 = vector.extract_strided_slice %45 {offsets = [0, 0], sizes = [16, 1], strides = [1, 1]} : vector<16x32xf32> to vector<16x1xf32>
    %47 = arith.negf %46 : vector<16x1xf32>
    %48 = math.exp %47 : vector<16x1xf32>
    %cst_19 = arith.constant 1.000000e+00 : f32
    %49 = vector.broadcast %cst_19 : f32 to vector<16x1xf32>
    %50 = arith.addf %49, %48 : vector<16x1xf32>
    %51 = arith.divf %49, %50 : vector<16x1xf32>
    %cst_20 = arith.constant 1.000000e+01 : f32
    %52 = vector.broadcast %cst_20 : f32 to vector<16x1xf32>
    %53 = arith.mulf %51, %52 : vector<16x1xf32>
    %cst_21 = arith.constant 1.500000e+00 : f32
    %54 = vector.broadcast %cst_21 : f32 to vector<16x1xf32>
    %55 = arith.addf %53, %54 : vector<16x1xf32>
    %cst_22 = arith.constant 0.000000e+00 : f32
    %56 = vector.broadcast %cst_22 : f32 to vector<16x32xf32>
    %57 = arith.select %8, %56, %45 : vector<16x32xi1>, vector<16x32xf32>
    %58 = arith.mulf %57, %57 : vector<16x32xf32>
    %cst_23 = arith.constant dense<0.000000e+00> : vector<16xf32>
    %59 = vector.multi_reduction <add>, %58, %cst_23 [1] : vector<16x32xf32> to vector<16xf32>
    %60 = vector.shape_cast %59 : vector<16xf32> to vector<16x1xf32>
    %cst_24 = arith.constant 9.99999993E-9 : f32
    %61 = vector.broadcast %cst_24 : f32 to vector<16x1xf32>
    %62 = arith.maximumf %60, %61 : vector<16x1xf32>
    %63 = arith.mulf %55, %55 : vector<16x1xf32>
    %cst_25 = arith.constant 1.000000e+00 : f32
    %64 = vector.broadcast %cst_25 : f32 to vector<16x1xf32>
    %65 = arith.subf %63, %64 : vector<16x1xf32>
    %66 = arith.divf %65, %62 : vector<16x1xf32>
    %cst_26 = arith.constant 9.99999993E-9 : f32
    %67 = vector.broadcast %cst_26 : f32 to vector<16x1xf32>
    %68 = arith.maximumf %66, %67 : vector<16x1xf32>
    %69 = math.sqrt %68 : vector<16x1xf32>
    %cst_27 = arith.constant -1.000000e+00 : f32
    %70 = vector.broadcast %cst_27 : f32 to vector<16x1xf32>
    %71 = arith.mulf %70, %55 : vector<16x1xf32>
    %72 = vector.broadcast %69 : vector<16x1xf32> to vector<16x32xf32>
    %73 = arith.mulf %57, %72 : vector<16x32xf32>
    %74 = vector.shape_cast %71 : vector<16x1xf32> to vector<16x1xf32>
    %75 = vector.broadcast %74 : vector<16x1xf32> to vector<16x32xf32>
    %76 = arith.select %8, %75, %73 : vector<16x32xi1>, vector<16x32xf32>
    %77 = vector.extract_strided_slice %44 {offsets = [0, 32], sizes = [16, 32], strides = [1, 1]} : vector<16x64xf32> to vector<16x32xf32>
    %78 = vector.extract_strided_slice %77 {offsets = [0, 0], sizes = [16, 1], strides = [1, 1]} : vector<16x32xf32> to vector<16x1xf32>
    %79 = arith.negf %78 : vector<16x1xf32>
    %80 = math.exp %79 : vector<16x1xf32>
    %cst_28 = arith.constant 1.000000e+00 : f32
    %81 = vector.broadcast %cst_28 : f32 to vector<16x1xf32>
    %82 = arith.addf %81, %80 : vector<16x1xf32>
    %83 = arith.divf %81, %82 : vector<16x1xf32>
    %cst_29 = arith.constant 1.000000e+01 : f32
    %84 = vector.broadcast %cst_29 : f32 to vector<16x1xf32>
    %85 = arith.mulf %83, %84 : vector<16x1xf32>
    %cst_30 = arith.constant 1.500000e+00 : f32
    %86 = vector.broadcast %cst_30 : f32 to vector<16x1xf32>
    %87 = arith.addf %85, %86 : vector<16x1xf32>
    %cst_31 = arith.constant 0.000000e+00 : f32
    %88 = vector.broadcast %cst_31 : f32 to vector<16x32xf32>
    %89 = arith.select %8, %88, %77 : vector<16x32xi1>, vector<16x32xf32>
    %90 = arith.mulf %89, %89 : vector<16x32xf32>
    %cst_32 = arith.constant dense<0.000000e+00> : vector<16xf32>
    %91 = vector.multi_reduction <add>, %90, %cst_32 [1] : vector<16x32xf32> to vector<16xf32>
    %92 = vector.shape_cast %91 : vector<16xf32> to vector<16x1xf32>
    %cst_33 = arith.constant 9.99999993E-9 : f32
    %93 = vector.broadcast %cst_33 : f32 to vector<16x1xf32>
    %94 = arith.maximumf %92, %93 : vector<16x1xf32>
    %95 = arith.mulf %87, %87 : vector<16x1xf32>
    %cst_34 = arith.constant 1.000000e+00 : f32
    %96 = vector.broadcast %cst_34 : f32 to vector<16x1xf32>
    %97 = arith.subf %95, %96 : vector<16x1xf32>
    %98 = arith.divf %97, %94 : vector<16x1xf32>
    %cst_35 = arith.constant 9.99999993E-9 : f32
    %99 = vector.broadcast %cst_35 : f32 to vector<16x1xf32>
    %100 = arith.maximumf %98, %99 : vector<16x1xf32>
    %101 = math.sqrt %100 : vector<16x1xf32>
    %cst_36 = arith.constant 1.000000e+00 : f32
    %102 = vector.broadcast %cst_36 : f32 to vector<16x1xf32>
    %103 = arith.mulf %102, %87 : vector<16x1xf32>
    %104 = vector.broadcast %101 : vector<16x1xf32> to vector<16x32xf32>
    %105 = arith.mulf %89, %104 : vector<16x32xf32>
    %106 = vector.shape_cast %103 : vector<16x1xf32> to vector<16x1xf32>
    %107 = vector.broadcast %106 : vector<16x1xf32> to vector<16x32xf32>
    %108 = arith.select %8, %107, %105 : vector<16x32xi1>, vector<16x32xf32>
    %c0_37 = arith.constant 0 : index
    %c0_38 = arith.constant 0 : index
    %109 = vector.load %arg6[%c0_37, %c0_38] : memref<16x32xf32, #tpu.memory_space<vmem>>, vector<16x32xf32>
    tpu.vector_store %arg6[%c0_37, %c0_38], %76 {strides = array<i32>} : memref<16x32xf32, #tpu.memory_space<vmem>>, vector<16x32xf32>,
    %110 = tpu.concatenate %39, %108 in 1 : vector<16x32xf32>, vector<16x32xf32> -> vector<16x64xf32>
    %c0_39 = arith.constant 0 : index
    %c0_40 = arith.constant 0 : index
    %111 = vector.load %arg7[%c0_39, %c0_40] : memref<16x64xf32, #tpu.memory_space<vmem>>, vector<16x64xf32>
    tpu.vector_store %arg7[%c0_39, %c0_40], %110 {strides = array<i32>} : memref<16x64xf32, #tpu.memory_space<vmem>>, vector<16x64xf32>,
    return
  }
  func.func @transform_0(%arg0: i32) -> (i32, i32) {
    %c0_i32 = arith.constant 0 : i32
    %c0_i32_0 = arith.constant 0 : i32
    return %arg0, %c0_i32 : i32, i32
  }
  func.func @transform_1(%arg0: i32) -> (i32, i32) {
    %c0_i32 = arith.constant 0 : i32
    %c0_i32_0 = arith.constant 0 : i32
    %c0_i32_1 = arith.constant 0 : i32
    return %c0_i32, %c0_i32_0 : i32, i32
  }
  func.func @transform_2(%arg0: i32) -> (i32, i32) {
    %c0_i32 = arith.constant 0 : i32
    %c0_i32_0 = arith.constant 0 : i32
    %c0_i32_1 = arith.constant 0 : i32
    return %c0_i32, %c0_i32_0 : i32, i32
  }
  func.func @transform_3(%arg0: i32) -> (i32, i32) {
    %c0_i32 = arith.constant 0 : i32
    %c0_i32_0 = arith.constant 0 : i32
    %c0_i32_1 = arith.constant 0 : i32
    return %c0_i32, %c0_i32_0 : i32, i32
  }
  func.func @transform_4(%arg0: i32) -> (i32, i32) {
    %c0_i32 = arith.constant 0 : i32
    %c0_i32_0 = arith.constant 0 : i32
    %c0_i32_1 = arith.constant 0 : i32
    return %c0_i32, %c0_i32_0 : i32, i32
  }
  func.func @transform_5(%arg0: i32) -> (i32, i32) {
    %c0_i32 = arith.constant 0 : i32
    %c0_i32_0 = arith.constant 0 : i32
    return %arg0, %c0_i32 : i32, i32
  }
  func.func @transform_6(%arg0: i32) -> (i32, i32) {
    %c0_i32 = arith.constant 0 : i32
    %c0_i32_0 = arith.constant 0 : i32
    return %arg0, %c0_i32 : i32, i32
  }
}

</mosaic_0001>

<bundles_post_ra>
// kernel: tpu_custom_call.1
= control target key start
LH: loop header
LB: loop body
LE: loop exit
PB: predicated region body
PF: predicated region fallthrough
CT: control target
= control target key end

     0   :  { %12 = vsyncpa [#allocation3], 0  ;;  %s904_s0 = inlined_call_operand.hbm [shape: f32[16,32], index: 0, kind: input, shape index: {}]   ;;  %s905_s1 = inlined_call_operand.hbm [shape: f32[32,32], index: 1, kind: input, shape index: {}]   ;;  %s906_s2 = inlined_call_operand.vmem [shape: f32[1,32], index: 2, kind: input, shape index: {}]   ;;  %s907_s3 = inlined_call_operand.hbm [shape: f32[32,64], index: 3, kind: input, shape index: {}]   ;;  %s908_s4 = inlined_call_operand.vmem [shape: f32[1,64], index: 4, kind: input, shape index: {}]   ;;  %s909_s5 = inlined_call_operand.hbm [shape: f32[16,32], index: 5, kind: output, shape index: {0}]   ;;  %s910_s6 = inlined_call_operand.hbm [shape: f32[16,64], index: 6, kind: output, shape index: {1}]  }
   0x1   :  { %13 = vsyncpa [#allocation6], 0 }
   0x2   :  { %14 = vsyncpa [#allocation4], 0 }
   0x3   :  { %15 = vsyncpa [#allocation10], 0  ;;  %s734_s21 = smov [#allocation5]   ;;  %s735_s23 = smov [#allocation2]  }
   0x4   :  { %s33_s22 = sshll.u32 %s734_s21, 4  ;;  %s21_s24 = sshll.u32 %s735_s23, 4  ;;  %s34_s22 = int_to_ptr.vmem [resolvable:$true] %s33_s22  ;;  %s22_s24 = int_to_ptr.vmem [resolvable:$true] %s21_s24 }
   0x5   :  { %s634_s25 = scalar_lea.vmem %s34_s22, 512  ;;  %p639_p1 = scmp.lt.s32.totalorder %s34_s22, %s34_s22 }
   0x6   :  { %p635_p0 = scmp.ne.s32.totalorder %s34_s22, %s634_s25  ;;  %p640_p2 = scmp.lt.s32.totalorder %s634_s25, %s634_s25 }
   0x8   :  { %p641_p3 = por %p640_p2, %p639_p1 }
   0xa   :  { %p642_p4 = pnand %p641_p3, %p635_p0 }
   0xc   :  { %645 = shalt.err (!%p642_p4)
}
   0xd   :  { %s736_s26 = smov 128   ;;  %s737_s27 = smov 8  }
   0xe   :  { %39 = dma.hbm_to_vmem [thread:$0]  %s905_s1, 512, %s34_s22, [#allocation6], %s736_s26, %s736_s26, %s737_s27  }
   0xf   :  { %s654_s30 = scalar_lea.vmem %s22_s24, 256  ;;  %p659_p6 = scmp.lt.s32.totalorder %s22_s24, %s22_s24 }
  0x10   :  { %p655_p5 = scmp.ne.s32.totalorder %s22_s24, %s654_s30  ;;  %p660_p7 = scmp.lt.s32.totalorder %s654_s30, %s654_s30 }
  0x12   :  { %p661_p8 = por %p660_p7, %p659_p6 }
  0x14   :  { %p662_p9 = pnand %p661_p8, %p655_p5 }
  0x16   :  { %665 = shalt.err (!%p662_p9)
}
  0x17   :  { %27 = dma.hbm_to_vmem [thread:$0]  %s904_s0, 256, %s22_s24, [#allocation3], %s736_s26, %s736_s26, %s737_s27  }
  0x18   :  { %s738_s9 = smov [#allocation7]  }
  0x19   :  { %s47_s10 = sshll.u32 %s738_s9, 4  ;;  %s48_s10 = int_to_ptr.vmem [resolvable:$true] %s47_s10 }
  0x1a   :  { %s674_s11 = scalar_lea.vmem %s48_s10, 512  ;;  %p679_p11 = scmp.lt.s32.totalorder %s48_s10, %s48_s10 }
  0x1b   :  { %p675_p10 = scmp.ne.s32.totalorder %s48_s10, %s674_s11  ;;  %p680_p12 = scmp.lt.s32.totalorder %s674_s11, %s674_s11 }
  0x1d   :  { %p681_p13 = por %p680_p12, %p679_p11 }
  0x1f   :  { %p682_p0 = pnand %p681_p13, %p675_p10 }
  0x21   :  { %685 = shalt.err (!%p682_p0)
}
  0x22   :  { %53 = dma.hbm_to_vmem [thread:$0]  %s907_s3, 512, %s48_s10, [#allocation6], %s736_s26, %s736_s26, %s737_s27  }
  0x23   :  { %726 = dma.done.wait [#allocation3], 256  }
  0x24   :  { %727 = vsyncadd [#allocation3], 4294967040 }
  0x25   :  { %728 = dma.done.wait [#allocation6], 1024  }
  0x26   :  { %729 = vsyncadd [#allocation6], 4294966272  ;;  %vm78_vm0 = vcmask 261120   ;;  %v70_v0 = vld [vmem:[#allocation5 + $0x18] sm:$0xff]  ;;  %v69_v1 = vld [vmem:[#allocation5 + $0x10] sm:$0xff]  ;;  %v739_v6 = vmov 0   ;;  %v160_v7 = vlaneseq }
  0x27   :  { %548 = vmatprep.subr.mxu0 %v70_v0  ;;  %v65_v2 = vld [vmem:[#allocation2] sm:$0xff]  ;;  %v68_v3 = vld [vmem:[#allocation5 + $0x8] sm:$0xff]  ;;  %v67_v4 = vld [vmem:[#allocation5] sm:$0xff]  ;;  %581 = vset.pattern.permute.xlu0 %v739_v6  ;;  %s740_s14 = smov 96   ;;  %s743_s15 = smov [#allocation8]  }
  0x28   :  { %549 = vmatpush3.msra.mxu0 %v70_v0  ;;  %556 = vmatprep.mubr.msk.f32.mxu0 %vm78_vm0, %v65_v2  ;;  %v66_v5 = vld [vmem:[#allocation2 + $0x8] sm:$0xff]  ;;  %v522_v8 = vld [vmem:[%s906_s2] ss:$0 sm:$0xff]  ;;  %v805_v9 = vand.u32 127, %v160_v7  ;;  %v240_v56 = vld [vmem:[#allocation7 + $0x8] sm:$0xff]  ;;  %s493_s16 = sshll.u32 %s743_s15, 4  ;;  %s494_s16 = int_to_ptr.vmem [resolvable:$true] %s493_s16 }
  0x29   :  { %550 = vmatprep.subr.mxu0 %v69_v1  ;;  %582 = vset.pattern.permute.xlu1 %v739_v6  ;;  %v242_v50 = vld [vmem:[#allocation7 + $0x18] sm:$0xff]  ;;  %v241_v51 = vld [vmem:[#allocation7 + $0x10] sm:$0xff]  ;;  %v239_v57 = vld [vmem:[#allocation7] sm:$0xff]  ;;  %s686_s17 = scalar_lea.vmem %s494_s16, 256  ;;  %p691_p2 = scmp.lt.s32.totalorder %s494_s16, %s494_s16 }
  0x2a   :  { %551 = vmatpush3.msra.mxu0 %v69_v1  ;;  %vm162_vm1 = vcmp.eq.s32.totalorder %v805_v9, 0  ;;  %559 = vmatprep.subr.mxu1 %v242_v50  ;;  %p687_p1 = scmp.ne.s32.totalorder %s494_s16, %s686_s17  ;;  %p692_p3 = scmp.lt.s32.totalorder %s686_s17, %s686_s17 }
  0x2b   :  { %552 = vmatprep.subr.mxu0 %v68_v3  ;;  %560 = vmatpush3.msra.mxu1 %v242_v50 }
  0x2c   :  { %553 = vmatpush3.msra.mxu0 %v68_v3  ;;  %561 = vmatprep.subr.mxu1 %v241_v51  ;;  %p693_p4 = por %p692_p3, %p691_p2 }
  0x2d   :  { %554 = vmatprep.subr.mxu0 %v67_v4  ;;  %562 = vmatpush3.msra.mxu1 %v241_v51 }
  0x2e   :  { %555 = vmatpush3.msra.mxu0 %v67_v4  ;;  %563 = vmatprep.subr.mxu1 %v240_v56  ;;  %p694_p5 = pnand %p693_p4, %p687_p1 }
  0x2f   :  { %557 = vmatmul.mubr.msk.f32.vlgmr.msra.gmra.mxu0 %vm78_vm0, %v66_v5  ;;  %564 = vmatpush3.msra.mxu1 %v240_v56  ;;  %v529_v5 = vld [vmem:[%s908_s4] ss:$0 sm:$0xff]  ;;  %s742_s4 = smov 32  }
  0x30   :  { %565 = vmatprep.subr.mxu1 %v239_v57 }
  0x31   :  { %566 = vmatpush3.msra.mxu1 %v239_v57 }
  0xef   :  { %v558_v10 = vpop.f32.mrf.mxu0 }
  0xf0   :  { %v157_v11 = vadd.f32 %v558_v10, %v522_v8  ;;  %v741_v10 = vmov 32  }
  0xf1   :  { %v151_v12 = vpop.f32.mrf.mxu0 }
  0xf2   :  { %v152_v13 = vadd.f32 %v522_v8, %v151_v12  ;;  %v810_v14 = vsel %vm162_vm1, 0.0, %v157_v11  ;;  %v526_v26 = vmul.f32 -1.442695, %v157_v11 }
  0xf3   :  { %v182_v19 = vmul.f32 %v810_v14, %v810_v14 }
  0xf4   :  { %v525_v15 = vmul.f32 -1.442695, %v152_v13  ;;  %v814_v16 = vsel %vm162_vm1, 0.0, %v152_v13 }
  0xf5   :  { %v181_v17 = vmul.f32 %v814_v16, %v814_v16  ;;  %v186_v20 = vsel %vm78_vm0, %v182_v19, 0.0 }
  0xf6   :  { %586 = vpow2.f32 %v525_v15 }
  0xf7   :  { %v183_v18 = vsel %vm78_vm0, %v181_v17, 0.0 }
  0xf8   :  { %184 = vadd.xlane.f32.xlu0 %v183_v18 }
  0xfc   :  { %187 = vadd.xlane.f32.xlu0 %v186_v20 }
 0x103   :  { %v587_v21 = vpop.eup %586 }
 0x104   :  { %v169_v22 = vadd.f32 1.0, %v587_v21 }
 0x106   :  { %588 = vrcp.f32 %v169_v22 }
 0x107   :  { %590 = vpow2.f32 %v526_v26 }
 0x113   :  { %v589_v23 = vpop.eup %588 }
 0x114   :  { %v175_v24 = vmul.f32 10.0, %v589_v23  ;;  %v591_v27 = vpop.eup %590 }
 0x115   :  { %v170_v28 = vadd.f32 1.0, %v591_v27 }
 0x116   :  { %v177_v25 = vadd.f32 1.5, %v175_v24 }
 0x117   :  { %592 = vrcp.f32 %v170_v28 }
 0x118   :  { %229 = vperm.xlu0 %581, %v177_v25   ;;  %v191_v36 = vmul.f32 %v177_v25, %v177_v25 }
 0x11a   :  { %v527_v38 = vadd.f32 -1.0, %v191_v36 }
 0x11c   :  { %584 = vset.pattern.permute.xlu0 %v741_v10 }
 0x124   :  { %v593_v31 = vpop.eup %592 }
 0x125   :  { %v176_v34 = vmul.f32 10.0, %v593_v31 }
 0x127   :  { %v178_v35 = vadd.f32 1.5, %v176_v34 }
 0x129   :  { %v192_v37 = vmul.f32 %v178_v35, %v178_v35 }
 0x12b   :  { %v528_v41 = vadd.f32 -1.0, %v192_v37 }
 0x181   :  { %v185_v29 = vpop.xlane.xlu0 %184 }
 0x182   :  { %v189_v30 = vmax.f32 %v185_v29, 1e-08 }
 0x184   :  { %594 = vrcp.f32 %v189_v30 }
 0x185   :  { %v188_v32 = vpop.xlane.xlu0 %187 }
 0x186   :  { %v190_v33 = vmax.f32 %v188_v32, 1e-08 }
 0x188   :  { %596 = vrcp.f32 %v190_v33 }
 0x191   :  { %v595_v39 = vpop.eup %594 }
 0x192   :  { %v196_v40 = vmul.f32 %v595_v39, %v527_v38 }
 0x193   :  { %v230_v63 = vpop.permute.xlu0 %229 }
 0x194   :  { %v199_v42 = vmax.f32 %v196_v40, 1e-08 }
 0x195   :  { %v597_v43 = vpop.eup %596 }
 0x196   :  { %v198_v44 = vmul.f32 %v597_v43, %v528_v41  ;;  %598 = vrsqrt.f32 %v199_v42  ;;  %vm203_vm4 = vcmp.eq.f32.partialorder %v199_v42, inf  ;;  %v206_v58 = vand.u32 2147483648, %v199_v42 }
 0x197   :  { %vm205_vm5 = vcmp.eq.f32.partialorder %v199_v42, 0.0 }
 0x198   :  { %v200_v45 = vmax.f32 %v198_v44, 1e-08 }
 0x19a   :  { %600 = vrsqrt.f32 %v200_v45  ;;  %vm210_vm2 = vcmp.eq.f32.partialorder %v200_v45, inf  ;;  %v213_v52 = vand.u32 2147483648, %v200_v45  ;;  %vm212_vm3 = vcmp.eq.f32.partialorder %v200_v45, 0.0 }
 0x1a3   :  { %v599_v46 = vpop.eup %598 }
 0x1a4   :  { %v202_v49 = vmul.f32 %v599_v46, %v199_v42 }
 0x1a6   :  { %v204_v55 = vsel %vm203_vm4, %v199_v42, %v202_v49 }
 0x1a7   :  { %v601_v47 = vpop.eup %600  ;;  %v207_v59 = vsel %vm205_vm5, %v206_v58, %v204_v55 }
 0x1a8   :  { %v209_v48 = vmul.f32 %v601_v47, %v200_v45 }
 0x1aa   :  { %v211_v53 = vsel %vm210_vm2, %v200_v45, %v209_v48 }
 0x1ab   :  { %v214_v54 = vsel %vm212_vm3, %v213_v52, %v211_v53 }
 0x1ac   :  { %222 = vperm.xlu1 %582, %v214_v54  }
 0x1b0   :  { %217 = vperm.xlu1 %582, %v207_v59  }
 0x1b4   :  { %234 = vperm.xlu1 %582, %v178_v35  }
 0x1b8   :  { %583 = vset.pattern.permute.xlu1 %v741_v10 }
 0x227   :  { %v223_v60 = vpop.permute.xlu1 %222 }
 0x228   :  { %v226_v0 = vmul.f32 %v223_v60, %v810_v14 }
 0x22b   :  { %v218_v61 = vpop.permute.xlu1 %217 }
 0x22c   :  { %v225_v62 = vmul.f32 %v218_v61, %v814_v16 }
 0x22e   :  { %v826_v1 = vsel %vm162_vm1, %v230_v63, %v225_v62 }
 0x22f   :  { %567 = vmatprep.mubr.msk.f32.mxu1 %vm78_vm0, %v826_v1  ;;  %v235_v2 = vpop.permute.xlu1 %234 }
 0x230   :  { %v832_v3 = vsel %vm162_vm1, %v235_v2, %v226_v0 }
 0x231   :  { %568 = vmatmul.mubr.msk.f32.vlgmr.msra.gmra.mxu1 %vm78_vm0, %v832_v3 }
 0x2f1   :  { %v569_v4 = vpop.f32.mrf.mxu1 }
 0x2f2   :  { %v328_v11 = vadd.f32 %v569_v4, %v529_v5 }
 0x2f3   :  { %v322_v7 = vpop.f32.mrf.mxu1 }
 0x2f4   :  { %v323_v8 = vadd.f32 %v529_v5, %v322_v7  ;;  %v858_v22 = vsel %vm162_vm1, 0.0, %v328_v11  ;;  %v533_v32 = vmul.f32 -1.442695, %v328_v11 }
 0x2f5   :  { %v350_v27 = vmul.f32 %v858_v22, %v858_v22 }
 0x2f6   :  { %411 = vrot.lane.b32.xlu1 %v323_v8, %s740_s14  ;;  %v532_v12 = vmul.f32 -1.442695, %v323_v8  ;;  %v845_v15 = vsel %vm162_vm1, 0.0, %v323_v8 }
 0x2f7   :  { %v349_v20 = vmul.f32 %v845_v15, %v845_v15  ;;  %v354_v28 = vsel %vm78_vm0, %v350_v27, 0.0 }
 0x2f8   :  { %602 = vpow2.f32 %v532_v12 }
 0x2f9   :  { %v351_v26 = vsel %vm78_vm0, %v349_v20, 0.0 }
 0x2fa   :  { %413 = vrot.lane.b32.xlu1 %v328_v11, %s740_s14 }
 0x305   :  { %v603_v16 = vpop.eup %602 }
 0x306   :  { %v337_v23 = vadd.f32 1.0, %v603_v16 }
 0x308   :  { %604 = vrcp.f32 %v337_v23 }
 0x309   :  { %606 = vpow2.f32 %v533_v32 }
 0x315   :  { %v605_v29 = vpop.eup %604 }
 0x316   :  { %v343_v30 = vmul.f32 10.0, %v605_v29  ;;  %v607_v33 = vpop.eup %606 }
 0x317   :  { %v338_v34 = vadd.f32 1.0, %v607_v33 }
 0x318   :  { %v867_v31 = vadd.f32 1.5, %v343_v30 }
 0x319   :  { %608 = vrcp.f32 %v338_v34 }
 0x31a   :  { %v359_v46 = vmul.f32 %v867_v31, %v867_v31 }
 0x31c   :  { %v534_v47 = vadd.f32 -1.0, %v359_v46 }
 0x326   :  { %v609_v37 = vpop.eup %608 }
 0x327   :  { %v344_v42 = vmul.f32 10.0, %v609_v37 }
 0x329   :  { %v346_v45 = vadd.f32 1.5, %v344_v42 }
 0x32b   :  { %v360_v48 = vmul.f32 %v346_v45, %v346_v45  ;;  %v384_v27 = vmul.f32 -1.0, %v346_v45 }
 0x32d   :  { %v535_v52 = vadd.f32 -1.0, %v360_v48 }
 0x368   :  { %v412_v13 = vpop.permute.xlu1 %411 }
 0x369   :  { %v841_v14 = vsel %vm162_vm1, 0.0, %v412_v13 }
 0x36a   :  { %v419_v17 = vmul.f32 %v841_v14, %v841_v14 }
 0x36c   :  { %v414_v18 = vpop.permute.xlu1 %413  ;;  %v421_v19 = vsel %vm78_vm0, %v419_v17, 0.0 }
 0x36d   :  { %v854_v21 = vsel %vm162_vm1, 0.0, %v414_v18  ;;  %422 = vadd.xlane.f32.xlu1 %v421_v19 }
 0x36e   :  { %v420_v24 = vmul.f32 %v854_v21, %v854_v21 }
 0x370   :  { %v424_v25 = vsel %vm78_vm0, %v420_v24, 0.0 }
 0x371   :  { %425 = vadd.xlane.f32.xlu0 %v424_v25  ;;  %352 = vadd.xlane.f32.xlu1 %v351_v26  ;;  %v383_v26 = vmul.f32 -1.0, %v867_v31 }
 0x375   :  { %355 = vadd.xlane.f32.xlu1 %v354_v28 }
 0x387   :  { %463 = vperm.xlu0 %584, %v867_v31  }
 0x3f6   :  { %v423_v35 = vpop.xlane.xlu1 %422 }
 0x3f7   :  { %v427_v36 = vmax.f32 %v423_v35, 1e-08 }
 0x3f9   :  { %610 = vrcp.f32 %v427_v36 }
 0x3fa   :  { %v426_v38 = vpop.xlane.xlu0 %425  ;;  %v353_v39 = vpop.xlane.xlu1 %352 }
 0x3fb   :  { %v428_v40 = vmax.f32 %v426_v38, 1e-08  ;;  %v357_v41 = vmax.f32 %v353_v39, 1e-08 }
 0x3fd   :  { %612 = vrcp.f32 %v428_v40 }
 0x3fe   :  { %614 = vrcp.f32 %v357_v41  ;;  %v356_v43 = vpop.xlane.xlu1 %355 }
 0x3ff   :  { %v358_v44 = vmax.f32 %v356_v43, 1e-08 }
 0x401   :  { %616 = vrcp.f32 %v358_v44 }
 0x402   :  { %v464_v32 = vpop.permute.xlu0 %463 }
 0x406   :  { %v611_v49 = vpop.eup %610 }
 0x407   :  { %v430_v50 = vmul.f32 %v611_v49, %v534_v47 }
 0x409   :  { %v433_v51 = vmax.f32 %v430_v50, 1e-08 }
 0x40a   :  { %v613_v53 = vpop.eup %612 }
 0x40b   :  { %v615_v54 = vpop.eup %614  ;;  %v432_v55 = vmul.f32 %v613_v53, %v535_v52  ;;  %618 = vrsqrt.f32 %v433_v51  ;;  %vm437_vm8 = vcmp.eq.f32.partialorder %v433_v51, inf  ;;  %v440_v10 = vand.u32 2147483648, %v433_v51 }
 0x40c   :  { %v364_v57 = vmul.f32 %v615_v54, %v534_v47  ;;  %vm439_vm9 = vcmp.eq.f32.partialorder %v433_v51, 0.0 }
 0x40d   :  { %v434_v56 = vmax.f32 %v432_v55, 1e-08 }
 0x40e   :  { %v617_v58 = vpop.eup %616  ;;  %v367_v59 = vmax.f32 %v364_v57, 1e-08 }
 0x40f   :  { %620 = vrsqrt.f32 %v434_v56  ;;  %v366_v60 = vmul.f32 %v617_v58, %v535_v52  ;;  %vm444_vm6 = vcmp.eq.f32.partialorder %v434_v56, inf  ;;  %v447_v4 = vand.u32 2147483648, %v434_v56 }
 0x410   :  { %622 = vrsqrt.f32 %v367_v59  ;;  %vm446_vm7 = vcmp.eq.f32.partialorder %v434_v56, 0.0  ;;  %vm371_vm10 = vcmp.eq.f32.partialorder %v367_v59, inf  ;;  %v374_v19 = vand.u32 2147483648, %v367_v59 }
 0x411   :  { %v368_v61 = vmax.f32 %v366_v60, 1e-08  ;;  %vm373_vm11 = vcmp.eq.f32.partialorder %v367_v59, 0.0 }
 0x413   :  { %624 = vrsqrt.f32 %v368_v61  ;;  %vm378_vm12 = vcmp.eq.f32.partialorder %v368_v61, inf  ;;  %v381_v24 = vand.u32 2147483648, %v368_v61  ;;  %vm380_vm13 = vcmp.eq.f32.partialorder %v368_v61, 0.0 }
 0x418   :  { %v619_v62 = vpop.eup %618 }
 0x419   :  { %v436_v2 = vmul.f32 %v619_v62, %v433_v51 }
 0x41b   :  { %v438_v8 = vsel %vm437_vm8, %v433_v51, %v436_v2 }
 0x41c   :  { %v621_v63 = vpop.eup %620  ;;  %v441_v12 = vsel %vm439_vm9, %v440_v10, %v438_v8 }
 0x41d   :  { %v443_v0 = vmul.f32 %v621_v63, %v434_v56  ;;  %v623_v11 = vpop.eup %622 }
 0x41e   :  { %v370_v13 = vmul.f32 %v623_v11, %v367_v59 }
 0x41f   :  { %v445_v5 = vsel %vm444_vm6, %v434_v56, %v443_v0 }
 0x420   :  { %v448_v7 = vsel %vm446_vm7, %v447_v4, %v445_v5  ;;  %v625_v16 = vpop.eup %624  ;;  %v372_v17 = vsel %vm371_vm10, %v367_v59, %v370_v13 }
 0x421   :  { %456 = vperm.xlu1 %583, %v448_v7   ;;  %v377_v18 = vmul.f32 %v625_v16, %v368_v61  ;;  %v375_v20 = vsel %vm373_vm11, %v374_v19, %v372_v17 }
 0x423   :  { %v379_v23 = vsel %vm378_vm12, %v368_v61, %v377_v18 }
 0x424   :  { %v382_v25 = vsel %vm380_vm13, %v381_v24, %v379_v23 }
 0x425   :  { %451 = vperm.xlu1 %583, %v441_v12  }
 0x429   :  { %468 = vperm.xlu1 %583, %v346_v45  }
 0x42d   :  { %585 = vset.pattern.permute.xlu1 %v739_v6 }
 0x42e   :  { %387 = vperm.xlu1 %585, %v375_v20  }
 0x432   :  { %392 = vperm.xlu1 %585, %v382_v25  }
 0x436   :  { %399 = vperm.xlu1 %585, %v383_v26  }
 0x43a   :  { %404 = vperm.xlu1 %585, %v384_v27  }
 0x49c   :  { %v457_v28 = vpop.permute.xlu1 %456 }
 0x49d   :  { %v460_v34 = vmul.f32 %v457_v28, %v854_v21 }
 0x4a0   :  { %v452_v29 = vpop.permute.xlu1 %451 }
 0x4a1   :  { %v459_v30 = vmul.f32 %v452_v29, %v841_v14 }
 0x4a3   :  { %v471_v6 = vsel %vm162_vm1, %v464_v32, %v459_v30 }
 0x4a4   :  { %v469_v33 = vpop.permute.xlu1 %468  ;;  %477 = vrot.lane.b32.xlu1 %v471_v6, %s742_s4 }
 0x4a5   :  { %v472_v35 = vsel %vm162_vm1, %v469_v33, %v460_v34 }
 0x4a8   :  { %479 = vrot.lane.b32.xlu1 %v472_v35, %s742_s4 }
 0x4a9   :  { %v388_v31 = vpop.permute.xlu1 %387 }
 0x4aa   :  { %v395_v37 = vmul.f32 %v388_v31, %v845_v15 }
 0x4ad   :  { %v393_v36 = vpop.permute.xlu1 %392 }
 0x4ae   :  { %v396_v39 = vmul.f32 %v393_v36, %v858_v22 }
 0x4b1   :  { %v400_v38 = vpop.permute.xlu1 %399 }
 0x4b2   :  { %v407_v14 = vsel %vm162_vm1, %v400_v38, %v395_v37 }
 0x4b3   :  { %473 = vst.msk [vmem:[#allocation8] sm:$0xff] %vm78_vm0, %v407_v14 }
 0x4b5   :  { %v405_v40 = vpop.permute.xlu1 %404 }
 0x4b6   :  { %v408_v21 = vsel %vm162_vm1, %v405_v40, %v396_v39 }
 0x4b7   :  { %474 = vst.msk [vmem:[#allocation8 + $0x8] sm:$0xff] %vm78_vm0, %v408_v21 }
 0x4b8   :  { %697 = shalt.err (!%p694_p5)
}
 0x4b9   :  { %499 = dma.vmem_to_hbm [thread:$0]  %s494_s16, 256, %s909_s5, [#allocation4], %s736_s26, %s736_s26, %s737_s27   ;;  %vm485_vm14 = vcmask 523264  }
 0x4ba   :  { %s744_s20 = smov [#allocation9]  }
 0x4bb   :  { %s505_s21 = sshll.u32 %s744_s20, 4  ;;  %s506_s21 = int_to_ptr.vmem [resolvable:$true] %s505_s21 }
 0x4bc   :  { %s706_s22 = scalar_lea.vmem %s506_s21, 256  ;;  %p711_p7 = scmp.lt.s32.totalorder %s506_s21, %s506_s21 }
 0x4bd   :  { %p707_p6 = scmp.ne.s32.totalorder %s506_s21, %s706_s22  ;;  %p712_p8 = scmp.lt.s32.totalorder %s706_s22, %s706_s22 }
 0x4bf   :  { %p713_p9 = por %p712_p8, %p711_p7 }
 0x4c1   :  { %p714_p10 = pnand %p713_p9, %p707_p6 }
 0x516   :  { %v478_v15 = vpop.permute.xlu1 %477 }
 0x517   :  { %v483_v9 = vsel %vm78_vm0, %v826_v1, %v478_v15 }
 0x518   :  { %486 = vst.msk [vmem:[#allocation9] sm:$0xff] %vm485_vm14, %v483_v9 }
 0x51a   :  { %v480_v22 = vpop.permute.xlu1 %479 }
 0x51b   :  { %v484_v41 = vsel %vm78_vm0, %v832_v3, %v480_v22 }
 0x51c   :  { %487 = vst.msk [vmem:[#allocation9 + $0x8] sm:$0xff] %vm485_vm14, %v484_v41 }
 0x51d   :  { %717 = shalt.err (!%p714_p10)
}
 0x51e   :  { %511 = dma.vmem_to_hbm [thread:$0]  %s506_s21, 256, %s910_s6, [#allocation10], %s736_s26, %s736_s26, %s737_s27  }
 0x51f   :  { %730 = dma.done.wait [#allocation4], 256  }
 0x520   :  { %731 = vsyncadd [#allocation4], 4294967040 }
 0x521   :  { %732 = dma.done.wait [#allocation10], 256  }
 0x522   :  { %733 = vsyncadd [#allocation10], 4294967040 }
 0x523   :  { %518 = vsyncpa [#allocation3], 1 }
 0x524   :  { %519 = vsyncpa [#allocation6], 1 }
 0x525   :  { %520 = vsyncpa [#allocation4], 1 }
 0x526   :  { %521 = vsyncpa [#allocation10], 1 }

</bundles_post_ra>
